<compile_context>
chip_gen: v7x
topology: tpu7x:2x2x1
jax: 0.10.0
libtpu: 0.0.40
codegen_flags: <defaults>
</compile_context>

<pallas_src>
import numpy as np
import jax
import jax.numpy as jnp
from jax import lax
from jax.experimental import pallas as pl
from jax.experimental.pallas import tpu as pltpu


_BN_EPS = 1e-5
_MXU_DTYPE = jnp.bfloat16  # matmul operand dtype (accumulation stays f32)


# ---------------------------------------------------------------------------
# Pallas kernel
# ---------------------------------------------------------------------------
def _fused_up_conv_kernel(x1_ref, x2_ref, w_ref, b_ref, o_ref):
    # x1_ref : (4, Hq, Wq, C1)   padded skip, split into (row-parity, col-parity) planes
    # x2_ref : (1, Ha+2, Wb+2, C2)  low-res input padded by 1 (upsample folded in weights)
    # w_ref  : (16*C1 + 9*C2, 4*Cout)  trace-time folded weights (bf16)
    # b_ref  : (1, 4*Cout)             folded conv-bias + BN bias (f32)
    # o_ref  : (1, THa, 2, Wb, 2*Cout) parity-packed output rows [t*THa, (t+1)*THa)
    tile_a = o_ref.shape[1]
    wb = o_ref.shape[3]
    two_cout = o_ref.shape[4]
    four_cout = 2 * two_cout
    c1 = x1_ref.shape[3]
    c2 = x2_ref.shape[3]
    m = tile_a * wb

    t = pl.program_id(1)
    a0 = pl.multiple_of(t * tile_a, tile_a)  # first low-res output row of this tile

    acc = jnp.zeros((m, four_cout), jnp.float32)
    off = 0

    # ---- skip branch: 16 (row-shift u, col-shift v) taps covering all 4 parity
    # classes.  Reads are plain contiguous slices of the parity-split planes; the
    # reshape below merges the leading dim into a sublane-aligned dim (no relayout).
    for u in range(4):
        for v in range(4):
            plane = (u % 2) * 2 + (v % 2)
            patch = x1_ref[plane, pl.ds(a0 + u // 2, tile_a), pl.ds(v // 2, wb), :]
            acc += jnp.dot(
                patch.reshape(m, c1).astype(w_ref.dtype),
                w_ref[off:off + c1, :],
                preferred_element_type=jnp.float32)
            off += c1

    # ---- upsampled branch: 9 low-res taps.  The 2x nearest upsample never
    # materializes: it is folded into w_ref (per-parity-class tap sums).
    for dr in range(3):
        for dc in range(3):
            patch = x2_ref[0, pl.ds(a0 + dr, tile_a), pl.ds(dc, wb), :]
            acc += jnp.dot(
                patch.reshape(m, c2).astype(w_ref.dtype),
                w_ref[off:off + c2, :],
                preferred_element_type=jnp.float32)
            off += c2

    # Folded bias + ReLU (f32 epilogue; works on v5e which has no bf16 VPU path).
    y = jnp.maximum(acc + b_ref[0], 0.0)

    # acc columns are ordered (si, sj, co); store each row-parity half.
    for si in range(2):
        y_si = y[:, si * two_cout:(si + 1) * two_cout]
        o_ref[0, :, si, :, :] = y_si.reshape(tile_a, wb, two_cout).astype(o_ref.dtype)


# ---------------------------------------------------------------------------
# Trace-time weight folding: BN scale + concat split + 2x nearest upsample
# ---------------------------------------------------------------------------
def _build_folded_weights(params, c1, c2, mxu_dtype):
    w = params["w_hwio"].astype(jnp.float32)            # (3, 3, c1+c2, cout)
    cout = w.shape[-1]
    scale = params["gamma"] / jnp.sqrt(params["running_var"] + _BN_EPS)
    bias = params["beta"] + scale * (params["conv_b"] - params["running_mean"])
    wf = w * scale[None, None, None, :]                  # BN scale folded into weights
    w1 = wf[:, :, :c1, :]                                # skip-branch weights
    w2 = wf[:, :, c1:, :]                                # upsampled-branch weights

    rows = []
    z1 = jnp.zeros((c1, cout), jnp.float32)
    # skip branch: output pixel (2a+si, 2b+sj) uses x1pad[2a+u, 2b+v] * w1[u-si, v-sj]
    for u in range(4):
        for v in range(4):
            cls = []
            for si in range(2):
                for sj in range(2):
                    kh, kw = u - si, v - sj
                    cls.append(w1[kh, kw] if (0 <= kh < 3 and 0 <= kw < 3) else z1)
            rows.append(jnp.concatenate(cls, axis=1))    # (c1, 4*cout)

    z2 = jnp.zeros((c2, cout), jnp.float32)
    # upsampled branch: nearest-upsample folded: padded low-res tap (dr, dc) collects
    # every 3x3 tap (kh, kw) with (si+kh+1)//2 == dr and (sj+kw+1)//2 == dc.
    for dr in range(3):
        for dc in range(3):
            cls = []
            for si in range(2):
                for sj in range(2):
                    acc = z2
                    for kh in range(3):
                        for kw in range(3):
                            if (si + kh + 1) // 2 == dr and (sj + kw + 1) // 2 == dc:
                                acc = acc + w2[kh, kw]
                    cls.append(acc)
            rows.append(jnp.concatenate(cls, axis=1))    # (c2, 4*cout)

    w_cat = jnp.concatenate(rows, axis=0).astype(mxu_dtype)   # (16*c1 + 9*c2, 4*cout)
    b_cat = jnp.tile(bias, 4).reshape(1, 4 * cout).astype(jnp.float32)
    return w_cat, b_cat


def _pick_row_tile(ha):
    for cand in (256, 128, 64, 32, 16, 8, 4):
        if ha % cand == 0 and ha // cand >= 2:
            return cand
    return ha


# ---------------------------------------------------------------------------
# NHWC forward (recommended entry point: no layout transposes on the data path)
# ---------------------------------------------------------------------------
def unet_up_forward_nhwc(inputs1, inputs2, params, *, row_tile=None,
                         mxu_dtype=_MXU_DTYPE):
    n, h1, w1_, c1 = inputs1.shape
    n2, hh, wh, c2 = inputs2.shape
    assert n == n2
    h, w = 2 * hh, 2 * wh
    cout = params["w_hwio"].shape[-1]

    offset = h - h1
    assert offset >= 0 and offset % 2 == 0, "size offset must be even (as in the module)"
    assert w - w1_ == offset, "module pads both spatial dims with the same offset"
    p = offset // 2

    # Skip branch: one pad (module offset + conv SAME halo), then an even/odd
    # parity split so the kernel only ever does contiguous reads (the only
    # remaining layout copy in XLA).
    x1p = jnp.pad(inputs1, ((0, 0), (1 + p, 1 + p), (1 + p, 1 + p), (0, 0)))
    hq, wq = (h + 2) // 2, (w + 2) // 2
    x1pp = (x1p.reshape(n, hq, 2, wq, 2, c1)
                .transpose(0, 2, 4, 1, 3, 5)            # (n, rp, cp, hq, wq, c1)
                .reshape(n * 4, hq, wq, c1))

    # Low-res branch: pad the *low-res* tensor by 1; its zero border exactly
    # provides the conv padding of the (never-materialized) upsampled tensor.
    x2p = jnp.pad(inputs2, ((0, 0), (1, 1), (1, 1), (0, 0)))   # (n, hh+2, wh+2, c2)

    w_cat, b_cat = _build_folded_weights(params, c1, c2, mxu_dtype)
    k = w_cat.shape[0]

    ha, wb = h // 2, w // 2
    tile_a = row_tile if row_tile is not None else _pick_row_tile(ha)
    assert ha % tile_a == 0
    n_tiles = ha // tile_a

    out = pl.pallas_call(
        _fused_up_conv_kernel,
        out_shape=jax.ShapeDtypeStruct((n, ha, 2, wb, 2 * cout), jnp.float32),
        grid_spec=pltpu.PrefetchScalarGridSpec(
            num_scalar_prefetch=0,
            grid=(n, n_tiles),
            in_specs=[
                pl.BlockSpec((4, hq, wq, c1), lambda i, t: (i, 0, 0, 0)),
                pl.BlockSpec((1, hh + 2, wh + 2, c2), lambda i, t: (i, 0, 0, 0)),
                pl.BlockSpec((k, 4 * cout), lambda i, t: (0, 0)),
                pl.BlockSpec((1, 4 * cout), lambda i, t: (0, 0)),
            ],
            out_specs=pl.BlockSpec((1, tile_a, 2, wb, 2 * cout),
                                   lambda i, t: (i, t, 0, 0, 0)),
        ),
        compiler_params=pltpu.CompilerParams(
            dimension_semantics=("parallel", "parallel")),
    )(x1pp, x2p, w_cat, b_cat)

    # (n, h/2, 2, w/2, 2*cout) -> (n, h, w, cout): adjacent-dim merges only, so this
    # is a zero-cost bitcast reshape in XLA (no HBM round trip).
    return out.reshape(n, h, w, cout)


# ---------------------------------------------------------------------------
# NCHW adapter (drop-in for the PyTorch module's interface)
# ---------------------------------------------------------------------------
def unet_up_forward(inputs1_nchw, inputs2_nchw, params, **kwargs):
    x1 = jnp.transpose(inputs1_nchw, (0, 2, 3, 1))
    x2 = jnp.transpose(inputs2_nchw, (0, 2, 3, 1))
    y = unet_up_forward_nhwc(x1, x2, params, **kwargs)
    return jnp.transpose(y, (0, 3, 1, 2))


# ---------------------------------------------------------------------------
# Pure-JAX references (for verification)
# ---------------------------------------------------------------------------
def unet_up_reference_nhwc(inputs1, inputs2, params):
    up = jnp.repeat(jnp.repeat(inputs2, 2, axis=1), 2, axis=2)
    offset = up.shape[1] - inputs1.shape[1]
    p = offset // 2
    x1p = jnp.pad(inputs1, ((0, 0), (p, p), (p, p), (0, 0)))
    x = jnp.concatenate([x1p, up], axis=-1)
    y = lax.conv_general_dilated(
        x, params["w_hwio"], window_strides=(1, 1), padding=((1, 1), (1, 1)),
        dimension_numbers=("NHWC", "HWIO", "NHWC"))
    y = y + params["conv_b"][None, None, None, :]
    scale = params["gamma"] / jnp.sqrt(params["running_var"] + _BN_EPS)
    y = scale * (y - params["running_mean"]) + params["beta"]
    return jnp.maximum(y, 0.0)


def unet_up_reference_nchw(inputs1, inputs2, params):
    x1 = jnp.transpose(inputs1, (0, 2, 3, 1))
    x2 = jnp.transpose(inputs2, (0, 2, 3, 1))
    y = unet_up_reference_nhwc(x1, x2, params)
    return jnp.transpose(y, (0, 3, 1, 2))


# ---------------------------------------------------------------------------
if __name__ == "__main__":
    # Small shapes consistent with the module:
    #   input_channel=4 (skip), concat_channel=4 (upsampled), output_channel=4
    N, C1, C2, H, W = 2, 4, 4, 16, 16
    Cout = 4

    key = jax.random.PRNGKey(0)
    k1, k2, k3, k4, k5, k6, k7, k8 = jax.random.split(key, 8)

    x1_nhwc = jax.random.normal(k1, (N, H, W, C1), jnp.float32)
    x2_nhwc = jax.random.normal(k2, (N, H // 2, W // 2, C2), jnp.float32)

    params = {
        # Conv2d(C1+C2, Cout, 3, 1, 1) weights stored HWIO.
        "w_hwio": 0.1 * jax.random.normal(k3, (3, 3, C1 + C2, Cout), jnp.float32),
        "conv_b": 0.1 * jax.random.normal(k4, (Cout,), jnp.float32),
        # BatchNorm2d(Cout) parameters (eval-mode running stats).
        "gamma": 1.0 + 0.1 * jax.random.normal(k5, (Cout,), jnp.float32),
        "beta": 0.1 * jax.random.normal(k6, (Cout,), jnp.float32),
        "running_mean": 0.1 * jax.random.normal(k7, (Cout,), jnp.float32),
        "running_var": 0.5 + jnp.abs(jax.random.normal(k8, (Cout,), jnp.float32)),
    }

    # NHWC fast path (recommended: no layout transposes anywhere).
    out_nhwc = jax.block_until_ready(
        jax.jit(unet_up_forward_nhwc)(x1_nhwc, x2_nhwc, params))
    ref_nhwc = jax.block_until_ready(
        unet_up_reference_nhwc(x1_nhwc, x2_nhwc, params))
    np.testing.assert_allclose(np.asarray(out_nhwc), np.asarray(ref_nhwc),
                               rtol=5e-2, atol=5e-2)  # bf16 MXU, f32 accumulation

    # NCHW adapter: exact PyTorch-module interface semantics.
    x1_nchw = jnp.transpose(x1_nhwc, (0, 3, 1, 2))
    x2_nchw = jnp.transpose(x2_nhwc, (0, 3, 1, 2))
    out_nchw = jax.block_until_ready(
        jax.jit(unet_up_forward)(x1_nchw, x2_nchw, params))
    ref_nchw = jax.block_until_ready(
        unet_up_reference_nchw(x1_nchw, x2_nchw, params))
    np.testing.assert_allclose(np.asarray(out_nchw), np.asarray(ref_nchw),
                               rtol=5e-2, atol=5e-2)

    print("KERNEL_OK")
</pallas_src>

<mosaic_0001>
module attributes {stable_mosaic.version = 11 : i64} {
  func.func @_fused_up_conv_kernel(%arg0: i32, %arg1: i32, %arg2: memref<4x9x9x4xf32, #tpu.memory_space<vmem>>, %arg3: memref<1x10x10x4xf32, #tpu.memory_space<vmem>>, %arg4: memref<100x16xbf16, #tpu.memory_space<vmem>>, %arg5: memref<1x16xf32, #tpu.memory_space<vmem>>, %arg6: memref<1x4x2x8x8xf32, #tpu.memory_space<vmem>>) attributes {dimension_semantics = [#tpu.dimension_semantics<parallel>, #tpu.dimension_semantics<parallel>], iteration_bounds = array<i64: 2, 2>, scalar_prefetch = 0 : i64, scratch_operands = 0 : i64, tpu.core_type = #tpu.core_type<tc>, window_params = [{transform_indices = @transform_0, window_bounds = array<i64: 4, 9, 9, 4>}, {transform_indices = @transform_1, window_bounds = array<i64: 1, 10, 10, 4>}, {pipeline_mode = #tpu.pipeline_mode<synchronous>, transform_indices = @transform_2, window_bounds = array<i64: 100, 16>}, {pipeline_mode = #tpu.pipeline_mode<synchronous>, transform_indices = @transform_3, window_bounds = array<i64: 1, 16>}, {transform_indices = @transform_4, window_bounds = array<i64: 1, 4, 2, 8, 8>}]} {
    %c4_i32 = arith.constant 4 : i32
    %0 = arith.muli %arg1, %c4_i32 : i32
    %1 = tpu.assume_multiple %0, 4 : i32
    %cst = arith.constant 0.000000e+00 : f32
    %2 = vector.broadcast %cst : f32 to vector<32x16xf32>
    %c0_i32 = arith.constant 0 : i32
    %3 = arith.addi %1, %c0_i32 : i32
    %c0 = arith.constant 0 : index
    %4 = arith.index_cast %3 : i32 to index
    %c0_0 = arith.constant 0 : index
    %c0_1 = arith.constant 0 : index
    %5 = vector.load %arg2[%c0, %4, %c0_0, %c0_1] : memref<4x9x9x4xf32, #tpu.memory_space<vmem>>, vector<1x4x8x4xf32>
    %6 = vector.shape_cast %5 : vector<1x4x8x4xf32> to vector<4x8x4xf32>
    %7 = vector.shape_cast %6 : vector<4x8x4xf32> to vector<32x4xf32>
    %8 = arith.truncf %7 : vector<32x4xf32> to vector<32x4xbf16>
    %c0_2 = arith.constant 0 : index
    %c0_3 = arith.constant 0 : index
    %9 = vector.load %arg4[%c0_2, %c0_3] : memref<100x16xbf16, #tpu.memory_space<vmem>>, vector<4x16xbf16>
    %cst_4 = arith.constant dense<0.000000e+00> : vector<32x16xf32>
    %10 = tpu.matmul %8, %9, %cst_4 {dimension_numbers = #tpu.dot_dimension_numbers<[1], [0], [0], [1], [0, 0, 1, 1], [], []>} : vector<32x4xbf16>, vector<4x16xbf16>, vector<32x16xf32> -> vector<32x16xf32>
    %11 = arith.addf %2, %10 : vector<32x16xf32>
    %c0_i32_5 = arith.constant 0 : i32
    %12 = arith.addi %1, %c0_i32_5 : i32
    %c1 = arith.constant 1 : index
    %13 = arith.index_cast %12 : i32 to index
    %c0_6 = arith.constant 0 : index
    %c0_7 = arith.constant 0 : index
    %14 = vector.load %arg2[%c1, %13, %c0_6, %c0_7] : memref<4x9x9x4xf32, #tpu.memory_space<vmem>>, vector<1x4x8x4xf32>
    %15 = vector.shape_cast %14 : vector<1x4x8x4xf32> to vector<4x8x4xf32>
    %16 = vector.shape_cast %15 : vector<4x8x4xf32> to vector<32x4xf32>
    %17 = arith.truncf %16 : vector<32x4xf32> to vector<32x4xbf16>
    %c4 = arith.constant 4 : index
    %c0_8 = arith.constant 0 : index
    %18 = vector.load %arg4[%c4, %c0_8] : memref<100x16xbf16, #tpu.memory_space<vmem>>, vector<4x16xbf16>
    %cst_9 = arith.constant dense<0.000000e+00> : vector<32x16xf32>
    %19 = tpu.matmul %17, %18, %cst_9 {dimension_numbers = #tpu.dot_dimension_numbers<[1], [0], [0], [1], [0, 0, 1, 1], [], []>} : vector<32x4xbf16>, vector<4x16xbf16>, vector<32x16xf32> -> vector<32x16xf32>
    %20 = arith.addf %11, %19 : vector<32x16xf32>
    %c0_i32_10 = arith.constant 0 : i32
    %21 = arith.addi %1, %c0_i32_10 : i32
    %c0_11 = arith.constant 0 : index
    %22 = arith.index_cast %21 : i32 to index
    %c1_12 = arith.constant 1 : index
    %c0_13 = arith.constant 0 : index
    %23 = vector.load %arg2[%c0_11, %22, %c1_12, %c0_13] : memref<4x9x9x4xf32, #tpu.memory_space<vmem>>, vector<1x4x8x4xf32>
    %24 = vector.shape_cast %23 : vector<1x4x8x4xf32> to vector<4x8x4xf32>
    %25 = vector.shape_cast %24 : vector<4x8x4xf32> to vector<32x4xf32>
    %26 = arith.truncf %25 : vector<32x4xf32> to vector<32x4xbf16>
    %c8 = arith.constant 8 : index
    %c0_14 = arith.constant 0 : index
    %27 = vector.load %arg4[%c8, %c0_14] : memref<100x16xbf16, #tpu.memory_space<vmem>>, vector<4x16xbf16>
    %cst_15 = arith.constant dense<0.000000e+00> : vector<32x16xf32>
    %28 = tpu.matmul %26, %27, %cst_15 {dimension_numbers = #tpu.dot_dimension_numbers<[1], [0], [0], [1], [0, 0, 1, 1], [], []>} : vector<32x4xbf16>, vector<4x16xbf16>, vector<32x16xf32> -> vector<32x16xf32>
    %29 = arith.addf %20, %28 : vector<32x16xf32>
    %c0_i32_16 = arith.constant 0 : i32
    %30 = arith.addi %1, %c0_i32_16 : i32
    %c1_17 = arith.constant 1 : index
    %31 = arith.index_cast %30 : i32 to index
    %c1_18 = arith.constant 1 : index
    %c0_19 = arith.constant 0 : index
    %32 = vector.load %arg2[%c1_17, %31, %c1_18, %c0_19] : memref<4x9x9x4xf32, #tpu.memory_space<vmem>>, vector<1x4x8x4xf32>
    %33 = vector.shape_cast %32 : vector<1x4x8x4xf32> to vector<4x8x4xf32>
    %34 = vector.shape_cast %33 : vector<4x8x4xf32> to vector<32x4xf32>
    %35 = arith.truncf %34 : vector<32x4xf32> to vector<32x4xbf16>
    %c12 = arith.constant 12 : index
    %c0_20 = arith.constant 0 : index
    %36 = vector.load %arg4[%c12, %c0_20] : memref<100x16xbf16, #tpu.memory_space<vmem>>, vector<4x16xbf16>
    %cst_21 = arith.constant dense<0.000000e+00> : vector<32x16xf32>
    %37 = tpu.matmul %35, %36, %cst_21 {dimension_numbers = #tpu.dot_dimension_numbers<[1], [0], [0], [1], [0, 0, 1, 1], [], []>} : vector<32x4xbf16>, vector<4x16xbf16>, vector<32x16xf32> -> vector<32x16xf32>
    %38 = arith.addf %29, %37 : vector<32x16xf32>
    %c0_i32_22 = arith.constant 0 : i32
    %39 = arith.addi %1, %c0_i32_22 : i32
    %c2 = arith.constant 2 : index
    %40 = arith.index_cast %39 : i32 to index
    %c0_23 = arith.constant 0 : index
    %c0_24 = arith.constant 0 : index
    %41 = vector.load %arg2[%c2, %40, %c0_23, %c0_24] : memref<4x9x9x4xf32, #tpu.memory_space<vmem>>, vector<1x4x8x4xf32>
    %42 = vector.shape_cast %41 : vector<1x4x8x4xf32> to vector<4x8x4xf32>
    %43 = vector.shape_cast %42 : vector<4x8x4xf32> to vector<32x4xf32>
    %44 = arith.truncf %43 : vector<32x4xf32> to vector<32x4xbf16>
    %c16 = arith.constant 16 : index
    %c0_25 = arith.constant 0 : index
    %45 = vector.load %arg4[%c16, %c0_25] : memref<100x16xbf16, #tpu.memory_space<vmem>>, vector<4x16xbf16>
    %cst_26 = arith.constant dense<0.000000e+00> : vector<32x16xf32>
    %46 = tpu.matmul %44, %45, %cst_26 {dimension_numbers = #tpu.dot_dimension_numbers<[1], [0], [0], [1], [0, 0, 1, 1], [], []>} : vector<32x4xbf16>, vector<4x16xbf16>, vector<32x16xf32> -> vector<32x16xf32>
    %47 = arith.addf %38, %46 : vector<32x16xf32>
    %c0_i32_27 = arith.constant 0 : i32
    %48 = arith.addi %1, %c0_i32_27 : i32
    %c3 = arith.constant 3 : index
    %49 = arith.index_cast %48 : i32 to index
    %c0_28 = arith.constant 0 : index
    %c0_29 = arith.constant 0 : index
    %50 = vector.load %arg2[%c3, %49, %c0_28, %c0_29] : memref<4x9x9x4xf32, #tpu.memory_space<vmem>>, vector<1x4x8x4xf32>
    %51 = vector.shape_cast %50 : vector<1x4x8x4xf32> to vector<4x8x4xf32>
    %52 = vector.shape_cast %51 : vector<4x8x4xf32> to vector<32x4xf32>
    %53 = arith.truncf %52 : vector<32x4xf32> to vector<32x4xbf16>
    %c20 = arith.constant 20 : index
    %c0_30 = arith.constant 0 : index
    %54 = vector.load %arg4[%c20, %c0_30] : memref<100x16xbf16, #tpu.memory_space<vmem>>, vector<4x16xbf16>
    %cst_31 = arith.constant dense<0.000000e+00> : vector<32x16xf32>
    %55 = tpu.matmul %53, %54, %cst_31 {dimension_numbers = #tpu.dot_dimension_numbers<[1], [0], [0], [1], [0, 0, 1, 1], [], []>} : vector<32x4xbf16>, vector<4x16xbf16>, vector<32x16xf32> -> vector<32x16xf32>
    %56 = arith.addf %47, %55 : vector<32x16xf32>
    %c0_i32_32 = arith.constant 0 : i32
    %57 = arith.addi %1, %c0_i32_32 : i32
    %c2_33 = arith.constant 2 : index
    %58 = arith.index_cast %57 : i32 to index
    %c1_34 = arith.constant 1 : index
    %c0_35 = arith.constant 0 : index
    %59 = vector.load %arg2[%c2_33, %58, %c1_34, %c0_35] : memref<4x9x9x4xf32, #tpu.memory_space<vmem>>, vector<1x4x8x4xf32>
    %60 = vector.shape_cast %59 : vector<1x4x8x4xf32> to vector<4x8x4xf32>
    %61 = vector.shape_cast %60 : vector<4x8x4xf32> to vector<32x4xf32>
    %62 = arith.truncf %61 : vector<32x4xf32> to vector<32x4xbf16>
    %c24 = arith.constant 24 : index
    %c0_36 = arith.constant 0 : index
    %63 = vector.load %arg4[%c24, %c0_36] : memref<100x16xbf16, #tpu.memory_space<vmem>>, vector<4x16xbf16>
    %cst_37 = arith.constant dense<0.000000e+00> : vector<32x16xf32>
    %64 = tpu.matmul %62, %63, %cst_37 {dimension_numbers = #tpu.dot_dimension_numbers<[1], [0], [0], [1], [0, 0, 1, 1], [], []>} : vector<32x4xbf16>, vector<4x16xbf16>, vector<32x16xf32> -> vector<32x16xf32>
    %65 = arith.addf %56, %64 : vector<32x16xf32>
    %c0_i32_38 = arith.constant 0 : i32
    %66 = arith.addi %1, %c0_i32_38 : i32
    %c3_39 = arith.constant 3 : index
    %67 = arith.index_cast %66 : i32 to index
    %c1_40 = arith.constant 1 : index
    %c0_41 = arith.constant 0 : index
    %68 = vector.load %arg2[%c3_39, %67, %c1_40, %c0_41] : memref<4x9x9x4xf32, #tpu.memory_space<vmem>>, vector<1x4x8x4xf32>
    %69 = vector.shape_cast %68 : vector<1x4x8x4xf32> to vector<4x8x4xf32>
    %70 = vector.shape_cast %69 : vector<4x8x4xf32> to vector<32x4xf32>
    %71 = arith.truncf %70 : vector<32x4xf32> to vector<32x4xbf16>
    %c28 = arith.constant 28 : index
    %c0_42 = arith.constant 0 : index
    %72 = vector.load %arg4[%c28, %c0_42] : memref<100x16xbf16, #tpu.memory_space<vmem>>, vector<4x16xbf16>
    %cst_43 = arith.constant dense<0.000000e+00> : vector<32x16xf32>
    %73 = tpu.matmul %71, %72, %cst_43 {dimension_numbers = #tpu.dot_dimension_numbers<[1], [0], [0], [1], [0, 0, 1, 1], [], []>} : vector<32x4xbf16>, vector<4x16xbf16>, vector<32x16xf32> -> vector<32x16xf32>
    %74 = arith.addf %65, %73 : vector<32x16xf32>
    %c1_i32 = arith.constant 1 : i32
    %75 = arith.addi %1, %c1_i32 : i32
    %c0_44 = arith.constant 0 : index
    %76 = arith.index_cast %75 : i32 to index
    %c0_45 = arith.constant 0 : index
    %c0_46 = arith.constant 0 : index
    %77 = vector.load %arg2[%c0_44, %76, %c0_45, %c0_46] : memref<4x9x9x4xf32, #tpu.memory_space<vmem>>, vector<1x4x8x4xf32>
    %78 = vector.shape_cast %77 : vector<1x4x8x4xf32> to vector<4x8x4xf32>
    %79 = vector.shape_cast %78 : vector<4x8x4xf32> to vector<32x4xf32>
    %80 = arith.truncf %79 : vector<32x4xf32> to vector<32x4xbf16>
    %c32 = arith.constant 32 : index
    %c0_47 = arith.constant 0 : index
    %81 = vector.load %arg4[%c32, %c0_47] : memref<100x16xbf16, #tpu.memory_space<vmem>>, vector<4x16xbf16>
    %cst_48 = arith.constant dense<0.000000e+00> : vector<32x16xf32>
    %82 = tpu.matmul %80, %81, %cst_48 {dimension_numbers = #tpu.dot_dimension_numbers<[1], [0], [0], [1], [0, 0, 1, 1], [], []>} : vector<32x4xbf16>, vector<4x16xbf16>, vector<32x16xf32> -> vector<32x16xf32>
    %83 = arith.addf %74, %82 : vector<32x16xf32>
    %c1_i32_49 = arith.constant 1 : i32
    %84 = arith.addi %1, %c1_i32_49 : i32
    %c1_50 = arith.constant 1 : index
    %85 = arith.index_cast %84 : i32 to index
    %c0_51 = arith.constant 0 : index
    %c0_52 = arith.constant 0 : index
    %86 = vector.load %arg2[%c1_50, %85, %c0_51, %c0_52] : memref<4x9x9x4xf32, #tpu.memory_space<vmem>>, vector<1x4x8x4xf32>
    %87 = vector.shape_cast %86 : vector<1x4x8x4xf32> to vector<4x8x4xf32>
    %88 = vector.shape_cast %87 : vector<4x8x4xf32> to vector<32x4xf32>
    %89 = arith.truncf %88 : vector<32x4xf32> to vector<32x4xbf16>
    %c36 = arith.constant 36 : index
    %c0_53 = arith.constant 0 : index
    %90 = vector.load %arg4[%c36, %c0_53] : memref<100x16xbf16, #tpu.memory_space<vmem>>, vector<4x16xbf16>
    %cst_54 = arith.constant dense<0.000000e+00> : vector<32x16xf32>
    %91 = tpu.matmul %89, %90, %cst_54 {dimension_numbers = #tpu.dot_dimension_numbers<[1], [0], [0], [1], [0, 0, 1, 1], [], []>} : vector<32x4xbf16>, vector<4x16xbf16>, vector<32x16xf32> -> vector<32x16xf32>
    %92 = arith.addf %83, %91 : vector<32x16xf32>
    %c1_i32_55 = arith.constant 1 : i32
    %93 = arith.addi %1, %c1_i32_55 : i32
    %c0_56 = arith.constant 0 : index
    %94 = arith.index_cast %93 : i32 to index
    %c1_57 = arith.constant 1 : index
    %c0_58 = arith.constant 0 : index
    %95 = vector.load %arg2[%c0_56, %94, %c1_57, %c0_58] : memref<4x9x9x4xf32, #tpu.memory_space<vmem>>, vector<1x4x8x4xf32>
    %96 = vector.shape_cast %95 : vector<1x4x8x4xf32> to vector<4x8x4xf32>
    %97 = vector.shape_cast %96 : vector<4x8x4xf32> to vector<32x4xf32>
    %98 = arith.truncf %97 : vector<32x4xf32> to vector<32x4xbf16>
    %c40 = arith.constant 40 : index
    %c0_59 = arith.constant 0 : index
    %99 = vector.load %arg4[%c40, %c0_59] : memref<100x16xbf16, #tpu.memory_space<vmem>>, vector<4x16xbf16>
    %cst_60 = arith.constant dense<0.000000e+00> : vector<32x16xf32>
    %100 = tpu.matmul %98, %99, %cst_60 {dimension_numbers = #tpu.dot_dimension_numbers<[1], [0], [0], [1], [0, 0, 1, 1], [], []>} : vector<32x4xbf16>, vector<4x16xbf16>, vector<32x16xf32> -> vector<32x16xf32>
    %101 = arith.addf %92, %100 : vector<32x16xf32>
    %c1_i32_61 = arith.constant 1 : i32
    %102 = arith.addi %1, %c1_i32_61 : i32
    %c1_62 = arith.constant 1 : index
    %103 = arith.index_cast %102 : i32 to index
    %c1_63 = arith.constant 1 : index
    %c0_64 = arith.constant 0 : index
    %104 = vector.load %arg2[%c1_62, %103, %c1_63, %c0_64] : memref<4x9x9x4xf32, #tpu.memory_space<vmem>>, vector<1x4x8x4xf32>
    %105 = vector.shape_cast %104 : vector<1x4x8x4xf32> to vector<4x8x4xf32>
    %106 = vector.shape_cast %105 : vector<4x8x4xf32> to vector<32x4xf32>
    %107 = arith.truncf %106 : vector<32x4xf32> to vector<32x4xbf16>
    %c44 = arith.constant 44 : index
    %c0_65 = arith.constant 0 : index
    %108 = vector.load %arg4[%c44, %c0_65] : memref<100x16xbf16, #tpu.memory_space<vmem>>, vector<4x16xbf16>
    %cst_66 = arith.constant dense<0.000000e+00> : vector<32x16xf32>
    %109 = tpu.matmul %107, %108, %cst_66 {dimension_numbers = #tpu.dot_dimension_numbers<[1], [0], [0], [1], [0, 0, 1, 1], [], []>} : vector<32x4xbf16>, vector<4x16xbf16>, vector<32x16xf32> -> vector<32x16xf32>
    %110 = arith.addf %101, %109 : vector<32x16xf32>
    %c1_i32_67 = arith.constant 1 : i32
    %111 = arith.addi %1, %c1_i32_67 : i32
    %c2_68 = arith.constant 2 : index
    %112 = arith.index_cast %111 : i32 to index
    %c0_69 = arith.constant 0 : index
    %c0_70 = arith.constant 0 : index
    %113 = vector.load %arg2[%c2_68, %112, %c0_69, %c0_70] : memref<4x9x9x4xf32, #tpu.memory_space<vmem>>, vector<1x4x8x4xf32>
    %114 = vector.shape_cast %113 : vector<1x4x8x4xf32> to vector<4x8x4xf32>
    %115 = vector.shape_cast %114 : vector<4x8x4xf32> to vector<32x4xf32>
    %116 = arith.truncf %115 : vector<32x4xf32> to vector<32x4xbf16>
    %c48 = arith.constant 48 : index
    %c0_71 = arith.constant 0 : index
    %117 = vector.load %arg4[%c48, %c0_71] : memref<100x16xbf16, #tpu.memory_space<vmem>>, vector<4x16xbf16>
    %cst_72 = arith.constant dense<0.000000e+00> : vector<32x16xf32>
    %118 = tpu.matmul %116, %117, %cst_72 {dimension_numbers = #tpu.dot_dimension_numbers<[1], [0], [0], [1], [0, 0, 1, 1], [], []>} : vector<32x4xbf16>, vector<4x16xbf16>, vector<32x16xf32> -> vector<32x16xf32>
    %119 = arith.addf %110, %118 : vector<32x16xf32>
    %c1_i32_73 = arith.constant 1 : i32
    %120 = arith.addi %1, %c1_i32_73 : i32
    %c3_74 = arith.constant 3 : index
    %121 = arith.index_cast %120 : i32 to index
    %c0_75 = arith.constant 0 : index
    %c0_76 = arith.constant 0 : index
    %122 = vector.load %arg2[%c3_74, %121, %c0_75, %c0_76] : memref<4x9x9x4xf32, #tpu.memory_space<vmem>>, vector<1x4x8x4xf32>
    %123 = vector.shape_cast %122 : vector<1x4x8x4xf32> to vector<4x8x4xf32>
    %124 = vector.shape_cast %123 : vector<4x8x4xf32> to vector<32x4xf32>
    %125 = arith.truncf %124 : vector<32x4xf32> to vector<32x4xbf16>
    %c52 = arith.constant 52 : index
    %c0_77 = arith.constant 0 : index
    %126 = vector.load %arg4[%c52, %c0_77] : memref<100x16xbf16, #tpu.memory_space<vmem>>, vector<4x16xbf16>
    %cst_78 = arith.constant dense<0.000000e+00> : vector<32x16xf32>
    %127 = tpu.matmul %125, %126, %cst_78 {dimension_numbers = #tpu.dot_dimension_numbers<[1], [0], [0], [1], [0, 0, 1, 1], [], []>} : vector<32x4xbf16>, vector<4x16xbf16>, vector<32x16xf32> -> vector<32x16xf32>
    %128 = arith.addf %119, %127 : vector<32x16xf32>
    %c1_i32_79 = arith.constant 1 : i32
    %129 = arith.addi %1, %c1_i32_79 : i32
    %c2_80 = arith.constant 2 : index
    %130 = arith.index_cast %129 : i32 to index
    %c1_81 = arith.constant 1 : index
    %c0_82 = arith.constant 0 : index
    %131 = vector.load %arg2[%c2_80, %130, %c1_81, %c0_82] : memref<4x9x9x4xf32, #tpu.memory_space<vmem>>, vector<1x4x8x4xf32>
    %132 = vector.shape_cast %131 : vector<1x4x8x4xf32> to vector<4x8x4xf32>
    %133 = vector.shape_cast %132 : vector<4x8x4xf32> to vector<32x4xf32>
    %134 = arith.truncf %133 : vector<32x4xf32> to vector<32x4xbf16>
    %c56 = arith.constant 56 : index
    %c0_83 = arith.constant 0 : index
    %135 = vector.load %arg4[%c56, %c0_83] : memref<100x16xbf16, #tpu.memory_space<vmem>>, vector<4x16xbf16>
    %cst_84 = arith.constant dense<0.000000e+00> : vector<32x16xf32>
    %136 = tpu.matmul %134, %135, %cst_84 {dimension_numbers = #tpu.dot_dimension_numbers<[1], [0], [0], [1], [0, 0, 1, 1], [], []>} : vector<32x4xbf16>, vector<4x16xbf16>, vector<32x16xf32> -> vector<32x16xf32>
    %137 = arith.addf %128, %136 : vector<32x16xf32>
    %c1_i32_85 = arith.constant 1 : i32
    %138 = arith.addi %1, %c1_i32_85 : i32
    %c3_86 = arith.constant 3 : index
    %139 = arith.index_cast %138 : i32 to index
    %c1_87 = arith.constant 1 : index
    %c0_88 = arith.constant 0 : index
    %140 = vector.load %arg2[%c3_86, %139, %c1_87, %c0_88] : memref<4x9x9x4xf32, #tpu.memory_space<vmem>>, vector<1x4x8x4xf32>
    %141 = vector.shape_cast %140 : vector<1x4x8x4xf32> to vector<4x8x4xf32>
    %142 = vector.shape_cast %141 : vector<4x8x4xf32> to vector<32x4xf32>
    %143 = arith.truncf %142 : vector<32x4xf32> to vector<32x4xbf16>
    %c60 = arith.constant 60 : index
    %c0_89 = arith.constant 0 : index
    %144 = vector.load %arg4[%c60, %c0_89] : memref<100x16xbf16, #tpu.memory_space<vmem>>, vector<4x16xbf16>
    %cst_90 = arith.constant dense<0.000000e+00> : vector<32x16xf32>
    %145 = tpu.matmul %143, %144, %cst_90 {dimension_numbers = #tpu.dot_dimension_numbers<[1], [0], [0], [1], [0, 0, 1, 1], [], []>} : vector<32x4xbf16>, vector<4x16xbf16>, vector<32x16xf32> -> vector<32x16xf32>
    %146 = arith.addf %137, %145 : vector<32x16xf32>
    %c0_i32_91 = arith.constant 0 : i32
    %147 = arith.addi %1, %c0_i32_91 : i32
    %c0_92 = arith.constant 0 : index
    %148 = arith.index_cast %147 : i32 to index
    %c0_93 = arith.constant 0 : index
    %c0_94 = arith.constant 0 : index
    %149 = vector.load %arg3[%c0_92, %148, %c0_93, %c0_94] : memref<1x10x10x4xf32, #tpu.memory_space<vmem>>, vector<1x4x8x4xf32>
    %150 = vector.shape_cast %149 : vector<1x4x8x4xf32> to vector<4x8x4xf32>
    %151 = vector.shape_cast %150 : vector<4x8x4xf32> to vector<32x4xf32>
    %152 = arith.truncf %151 : vector<32x4xf32> to vector<32x4xbf16>
    %c64 = arith.constant 64 : index
    %c0_95 = arith.constant 0 : index
    %153 = vector.load %arg4[%c64, %c0_95] : memref<100x16xbf16, #tpu.memory_space<vmem>>, vector<4x16xbf16>
    %cst_96 = arith.constant dense<0.000000e+00> : vector<32x16xf32>
    %154 = tpu.matmul %152, %153, %cst_96 {dimension_numbers = #tpu.dot_dimension_numbers<[1], [0], [0], [1], [0, 0, 1, 1], [], []>} : vector<32x4xbf16>, vector<4x16xbf16>, vector<32x16xf32> -> vector<32x16xf32>
    %155 = arith.addf %146, %154 : vector<32x16xf32>
    %c0_i32_97 = arith.constant 0 : i32
    %156 = arith.addi %1, %c0_i32_97 : i32
    %c0_98 = arith.constant 0 : index
    %157 = arith.index_cast %156 : i32 to index
    %c1_99 = arith.constant 1 : index
    %c0_100 = arith.constant 0 : index
    %158 = vector.load %arg3[%c0_98, %157, %c1_99, %c0_100] : memref<1x10x10x4xf32, #tpu.memory_space<vmem>>, vector<1x4x8x4xf32>
    %159 = vector.shape_cast %158 : vector<1x4x8x4xf32> to vector<4x8x4xf32>
    %160 = vector.shape_cast %159 : vector<4x8x4xf32> to vector<32x4xf32>
    %161 = arith.truncf %160 : vector<32x4xf32> to vector<32x4xbf16>
    %c68 = arith.constant 68 : index
    %c0_101 = arith.constant 0 : index
    %162 = vector.load %arg4[%c68, %c0_101] : memref<100x16xbf16, #tpu.memory_space<vmem>>, vector<4x16xbf16>
    %cst_102 = arith.constant dense<0.000000e+00> : vector<32x16xf32>
    %163 = tpu.matmul %161, %162, %cst_102 {dimension_numbers = #tpu.dot_dimension_numbers<[1], [0], [0], [1], [0, 0, 1, 1], [], []>} : vector<32x4xbf16>, vector<4x16xbf16>, vector<32x16xf32> -> vector<32x16xf32>
    %164 = arith.addf %155, %163 : vector<32x16xf32>
    %c0_i32_103 = arith.constant 0 : i32
    %165 = arith.addi %1, %c0_i32_103 : i32
    %c0_104 = arith.constant 0 : index
    %166 = arith.index_cast %165 : i32 to index
    %c2_105 = arith.constant 2 : index
    %c0_106 = arith.constant 0 : index
    %167 = vector.load %arg3[%c0_104, %166, %c2_105, %c0_106] : memref<1x10x10x4xf32, #tpu.memory_space<vmem>>, vector<1x4x8x4xf32>
    %168 = vector.shape_cast %167 : vector<1x4x8x4xf32> to vector<4x8x4xf32>
    %169 = vector.shape_cast %168 : vector<4x8x4xf32> to vector<32x4xf32>
    %170 = arith.truncf %169 : vector<32x4xf32> to vector<32x4xbf16>
    %c72 = arith.constant 72 : index
    %c0_107 = arith.constant 0 : index
    %171 = vector.load %arg4[%c72, %c0_107] : memref<100x16xbf16, #tpu.memory_space<vmem>>, vector<4x16xbf16>
    %cst_108 = arith.constant dense<0.000000e+00> : vector<32x16xf32>
    %172 = tpu.matmul %170, %171, %cst_108 {dimension_numbers = #tpu.dot_dimension_numbers<[1], [0], [0], [1], [0, 0, 1, 1], [], []>} : vector<32x4xbf16>, vector<4x16xbf16>, vector<32x16xf32> -> vector<32x16xf32>
    %173 = arith.addf %164, %172 : vector<32x16xf32>
    %c1_i32_109 = arith.constant 1 : i32
    %174 = arith.addi %1, %c1_i32_109 : i32
    %c0_110 = arith.constant 0 : index
    %175 = arith.index_cast %174 : i32 to index
    %c0_111 = arith.constant 0 : index
    %c0_112 = arith.constant 0 : index
    %176 = vector.load %arg3[%c0_110, %175, %c0_111, %c0_112] : memref<1x10x10x4xf32, #tpu.memory_space<vmem>>, vector<1x4x8x4xf32>
    %177 = vector.shape_cast %176 : vector<1x4x8x4xf32> to vector<4x8x4xf32>
    %178 = vector.shape_cast %177 : vector<4x8x4xf32> to vector<32x4xf32>
    %179 = arith.truncf %178 : vector<32x4xf32> to vector<32x4xbf16>
    %c76 = arith.constant 76 : index
    %c0_113 = arith.constant 0 : index
    %180 = vector.load %arg4[%c76, %c0_113] : memref<100x16xbf16, #tpu.memory_space<vmem>>, vector<4x16xbf16>
    %cst_114 = arith.constant dense<0.000000e+00> : vector<32x16xf32>
    %181 = tpu.matmul %179, %180, %cst_114 {dimension_numbers = #tpu.dot_dimension_numbers<[1], [0], [0], [1], [0, 0, 1, 1], [], []>} : vector<32x4xbf16>, vector<4x16xbf16>, vector<32x16xf32> -> vector<32x16xf32>
    %182 = arith.addf %173, %181 : vector<32x16xf32>
    %c1_i32_115 = arith.constant 1 : i32
    %183 = arith.addi %1, %c1_i32_115 : i32
    %c0_116 = arith.constant 0 : index
    %184 = arith.index_cast %183 : i32 to index
    %c1_117 = arith.constant 1 : index
    %c0_118 = arith.constant 0 : index
    %185 = vector.load %arg3[%c0_116, %184, %c1_117, %c0_118] : memref<1x10x10x4xf32, #tpu.memory_space<vmem>>, vector<1x4x8x4xf32>
    %186 = vector.shape_cast %185 : vector<1x4x8x4xf32> to vector<4x8x4xf32>
    %187 = vector.shape_cast %186 : vector<4x8x4xf32> to vector<32x4xf32>
    %188 = arith.truncf %187 : vector<32x4xf32> to vector<32x4xbf16>
    %c80 = arith.constant 80 : index
    %c0_119 = arith.constant 0 : index
    %189 = vector.load %arg4[%c80, %c0_119] : memref<100x16xbf16, #tpu.memory_space<vmem>>, vector<4x16xbf16>
    %cst_120 = arith.constant dense<0.000000e+00> : vector<32x16xf32>
    %190 = tpu.matmul %188, %189, %cst_120 {dimension_numbers = #tpu.dot_dimension_numbers<[1], [0], [0], [1], [0, 0, 1, 1], [], []>} : vector<32x4xbf16>, vector<4x16xbf16>, vector<32x16xf32> -> vector<32x16xf32>
    %191 = arith.addf %182, %190 : vector<32x16xf32>
    %c1_i32_121 = arith.constant 1 : i32
    %192 = arith.addi %1, %c1_i32_121 : i32
    %c0_122 = arith.constant 0 : index
    %193 = arith.index_cast %192 : i32 to index
    %c2_123 = arith.constant 2 : index
    %c0_124 = arith.constant 0 : index
    %194 = vector.load %arg3[%c0_122, %193, %c2_123, %c0_124] : memref<1x10x10x4xf32, #tpu.memory_space<vmem>>, vector<1x4x8x4xf32>
    %195 = vector.shape_cast %194 : vector<1x4x8x4xf32> to vector<4x8x4xf32>
    %196 = vector.shape_cast %195 : vector<4x8x4xf32> to vector<32x4xf32>
    %197 = arith.truncf %196 : vector<32x4xf32> to vector<32x4xbf16>
    %c84 = arith.constant 84 : index
    %c0_125 = arith.constant 0 : index
    %198 = vector.load %arg4[%c84, %c0_125] : memref<100x16xbf16, #tpu.memory_space<vmem>>, vector<4x16xbf16>
    %cst_126 = arith.constant dense<0.000000e+00> : vector<32x16xf32>
    %199 = tpu.matmul %197, %198, %cst_126 {dimension_numbers = #tpu.dot_dimension_numbers<[1], [0], [0], [1], [0, 0, 1, 1], [], []>} : vector<32x4xbf16>, vector<4x16xbf16>, vector<32x16xf32> -> vector<32x16xf32>
    %200 = arith.addf %191, %199 : vector<32x16xf32>
    %c2_i32 = arith.constant 2 : i32
    %201 = arith.addi %1, %c2_i32 : i32
    %c0_127 = arith.constant 0 : index
    %202 = arith.index_cast %201 : i32 to index
    %c0_128 = arith.constant 0 : index
    %c0_129 = arith.constant 0 : index
    %203 = vector.load %arg3[%c0_127, %202, %c0_128, %c0_129] : memref<1x10x10x4xf32, #tpu.memory_space<vmem>>, vector<1x4x8x4xf32>
    %204 = vector.shape_cast %203 : vector<1x4x8x4xf32> to vector<4x8x4xf32>
    %205 = vector.shape_cast %204 : vector<4x8x4xf32> to vector<32x4xf32>
    %206 = arith.truncf %205 : vector<32x4xf32> to vector<32x4xbf16>
    %c88 = arith.constant 88 : index
    %c0_130 = arith.constant 0 : index
    %207 = vector.load %arg4[%c88, %c0_130] : memref<100x16xbf16, #tpu.memory_space<vmem>>, vector<4x16xbf16>
    %cst_131 = arith.constant dense<0.000000e+00> : vector<32x16xf32>
    %208 = tpu.matmul %206, %207, %cst_131 {dimension_numbers = #tpu.dot_dimension_numbers<[1], [0], [0], [1], [0, 0, 1, 1], [], []>} : vector<32x4xbf16>, vector<4x16xbf16>, vector<32x16xf32> -> vector<32x16xf32>
    %209 = arith.addf %200, %208 : vector<32x16xf32>
    %c2_i32_132 = arith.constant 2 : i32
    %210 = arith.addi %1, %c2_i32_132 : i32
    %c0_133 = arith.constant 0 : index
    %211 = arith.index_cast %210 : i32 to index
    %c1_134 = arith.constant 1 : index
    %c0_135 = arith.constant 0 : index
    %212 = vector.load %arg3[%c0_133, %211, %c1_134, %c0_135] : memref<1x10x10x4xf32, #tpu.memory_space<vmem>>, vector<1x4x8x4xf32>
    %213 = vector.shape_cast %212 : vector<1x4x8x4xf32> to vector<4x8x4xf32>
    %214 = vector.shape_cast %213 : vector<4x8x4xf32> to vector<32x4xf32>
    %215 = arith.truncf %214 : vector<32x4xf32> to vector<32x4xbf16>
    %c92 = arith.constant 92 : index
    %c0_136 = arith.constant 0 : index
    %216 = vector.load %arg4[%c92, %c0_136] : memref<100x16xbf16, #tpu.memory_space<vmem>>, vector<4x16xbf16>
    %cst_137 = arith.constant dense<0.000000e+00> : vector<32x16xf32>
    %217 = tpu.matmul %215, %216, %cst_137 {dimension_numbers = #tpu.dot_dimension_numbers<[1], [0], [0], [1], [0, 0, 1, 1], [], []>} : vector<32x4xbf16>, vector<4x16xbf16>, vector<32x16xf32> -> vector<32x16xf32>
    %218 = arith.addf %209, %217 : vector<32x16xf32>
    %c2_i32_138 = arith.constant 2 : i32
    %219 = arith.addi %1, %c2_i32_138 : i32
    %c0_139 = arith.constant 0 : index
    %220 = arith.index_cast %219 : i32 to index
    %c2_140 = arith.constant 2 : index
    %c0_141 = arith.constant 0 : index
    %221 = vector.load %arg3[%c0_139, %220, %c2_140, %c0_141] : memref<1x10x10x4xf32, #tpu.memory_space<vmem>>, vector<1x4x8x4xf32>
    %222 = vector.shape_cast %221 : vector<1x4x8x4xf32> to vector<4x8x4xf32>
    %223 = vector.shape_cast %222 : vector<4x8x4xf32> to vector<32x4xf32>
    %224 = arith.truncf %223 : vector<32x4xf32> to vector<32x4xbf16>
    %c96 = arith.constant 96 : index
    %c0_142 = arith.constant 0 : index
    %225 = vector.load %arg4[%c96, %c0_142] : memref<100x16xbf16, #tpu.memory_space<vmem>>, vector<4x16xbf16>
    %cst_143 = arith.constant dense<0.000000e+00> : vector<32x16xf32>
    %226 = tpu.matmul %224, %225, %cst_143 {dimension_numbers = #tpu.dot_dimension_numbers<[1], [0], [0], [1], [0, 0, 1, 1], [], []>} : vector<32x4xbf16>, vector<4x16xbf16>, vector<32x16xf32> -> vector<32x16xf32>
    %227 = arith.addf %218, %226 : vector<32x16xf32>
    %c0_144 = arith.constant 0 : index
    %c0_145 = arith.constant 0 : index
    %228 = vector.load %arg5[%c0_144, %c0_145] : memref<1x16xf32, #tpu.memory_space<vmem>>, vector<1x16xf32>
    %229 = vector.shape_cast %228 : vector<1x16xf32> to vector<16xf32>
    %230 = vector.shape_cast %229 : vector<16xf32> to vector<1x16xf32>
    %231 = vector.broadcast %230 : vector<1x16xf32> to vector<32x16xf32>
    %232 = arith.addf %227, %231 : vector<32x16xf32>
    %cst_146 = arith.constant 0.000000e+00 : f32
    %233 = vector.broadcast %cst_146 : f32 to vector<32x16xf32>
    %234 = arith.maximumf %232, %233 : vector<32x16xf32>
    %235 = vector.extract_strided_slice %234 {offsets = [0, 0], sizes = [32, 8], strides = [1, 1]} : vector<32x16xf32> to vector<32x8xf32>
    %236 = vector.shape_cast %235 : vector<32x8xf32> to vector<4x8x8xf32>
    %c0_147 = arith.constant 0 : index
    %c0_148 = arith.constant 0 : index
    %c0_149 = arith.constant 0 : index
    %c0_150 = arith.constant 0 : index
    %c0_151 = arith.constant 0 : index
    %237 = vector.load %arg6[%c0_147, %c0_148, %c0_149, %c0_150, %c0_151] : memref<1x4x2x8x8xf32, #tpu.memory_space<vmem>>, vector<1x4x1x8x8xf32>
    %238 = vector.shape_cast %237 : vector<1x4x1x8x8xf32> to vector<4x8x8xf32>
    %239 = vector.shape_cast %236 : vector<4x8x8xf32> to vector<1x4x1x8x8xf32>
    tpu.vector_store %arg6[%c0_147, %c0_148, %c0_149, %c0_150, %c0_151], %239 {strides = array<i32>} : memref<1x4x2x8x8xf32, #tpu.memory_space<vmem>>, vector<1x4x1x8x8xf32>,
    %240 = vector.extract_strided_slice %234 {offsets = [0, 8], sizes = [32, 8], strides = [1, 1]} : vector<32x16xf32> to vector<32x8xf32>
    %241 = vector.shape_cast %240 : vector<32x8xf32> to vector<4x8x8xf32>
    %c0_152 = arith.constant 0 : index
    %c0_153 = arith.constant 0 : index
    %c1_154 = arith.constant 1 : index
    %c0_155 = arith.constant 0 : index
    %c0_156 = arith.constant 0 : index
    %242 = vector.load %arg6[%c0_152, %c0_153, %c1_154, %c0_155, %c0_156] : memref<1x4x2x8x8xf32, #tpu.memory_space<vmem>>, vector<1x4x1x8x8xf32>
    %243 = vector.shape_cast %242 : vector<1x4x1x8x8xf32> to vector<4x8x8xf32>
    %244 = vector.shape_cast %241 : vector<4x8x8xf32> to vector<1x4x1x8x8xf32>
    tpu.vector_store %arg6[%c0_152, %c0_153, %c1_154, %c0_155, %c0_156], %244 {strides = array<i32>} : memref<1x4x2x8x8xf32, #tpu.memory_space<vmem>>, vector<1x4x1x8x8xf32>,
    return
  }
  func.func @transform_0(%arg0: i32, %arg1: i32) -> (i32, i32, i32, i32) {
    %c0_i32 = arith.constant 0 : i32
    %c0_i32_0 = arith.constant 0 : i32
    %c0_i32_1 = arith.constant 0 : i32
    %c0_i32_2 = arith.constant 0 : i32
    return %arg0, %c0_i32, %c0_i32_0, %c0_i32_1 : i32, i32, i32, i32
  }
  func.func @transform_1(%arg0: i32, %arg1: i32) -> (i32, i32, i32, i32) {
    %c0_i32 = arith.constant 0 : i32
    %c0_i32_0 = arith.constant 0 : i32
    %c0_i32_1 = arith.constant 0 : i32
    %c0_i32_2 = arith.constant 0 : i32
    return %arg0, %c0_i32, %c0_i32_0, %c0_i32_1 : i32, i32, i32, i32
  }
  func.func @transform_2(%arg0: i32, %arg1: i32) -> (i32, i32) {
    %c0_i32 = arith.constant 0 : i32
    %c0_i32_0 = arith.constant 0 : i32
    %c0_i32_1 = arith.constant 0 : i32
    return %c0_i32, %c0_i32_0 : i32, i32
  }
  func.func @transform_3(%arg0: i32, %arg1: i32) -> (i32, i32) {
    %c0_i32 = arith.constant 0 : i32
    %c0_i32_0 = arith.constant 0 : i32
    %c0_i32_1 = arith.constant 0 : i32
    return %c0_i32, %c0_i32_0 : i32, i32
  }
  func.func @transform_4(%arg0: i32, %arg1: i32) -> (i32, i32, i32, i32, i32) {
    %c0_i32 = arith.constant 0 : i32
    %c0_i32_0 = arith.constant 0 : i32
    %c0_i32_1 = arith.constant 0 : i32
    %c0_i32_2 = arith.constant 0 : i32
    return %arg0, %arg1, %c0_i32, %c0_i32_0, %c0_i32_1 : i32, i32, i32, i32, i32
  }
}

</mosaic_0001>

<bundles_post_ra>
// kernel: tile.8
= control target key start
LH: loop header
LB: loop body
LE: loop exit
PB: predicated region body
PF: predicated region fallthrough
CT: control target
= control target key end

     0   :  { %s22_s0 = inlined_call_operand.vmem [shape: f32[4], index: 0, kind: input, shape index: {}]   ;;  %s23_s1 = inlined_call_operand.vmem [shape: f32[4,4], index: 1, kind: output, shape index: {}]  }
   0x1   :  { %v4_v0 = vld [vmem:[%s22_s0] ss:$0 sm:$0xff] }
   0x2   :  { %5 = vst [vmem:[%s23_s1] sm:$0xf] %v4_v0 }

// kernel: tile.9
= control target key start
LH: loop header
LB: loop body
LE: loop exit
PB: predicated region body
PF: predicated region fallthrough
CT: control target
= control target key end

     0   :  { %vm7_vm0 = vcmask 31744   ;;  %s37_s8 = smov 4   ;;  %s38_s9 = smov 8   ;;  %vm13_vm1 = vcmask 130144   ;;  %vm19_vm2 = vcmask 97344   ;;  %vm25_vm3 = vcmask 64544   ;;  %s55_s0 = inlined_call_operand.vmem [shape: f32[4,4], index: 0, kind: input, shape index: {}]   ;;  %s56_s1 = inlined_call_operand.vmem [shape: f32[1,16], index: 1, kind: output, shape index: {}]  }
   0x1   :  { %v4_v0 = vld [vmem:[%s55_s0] sm:$0xf]  ;;  %s36_s0 = smov 12  }
   0x2   :  { %5 = vst [vmem:[#allocation1] sm:$0xf] %v4_v0 }
   0x9   :  { %v10_v1 = vld [vmem:[#allocation1 + $0x3] sm:$0x1]   ;;  %v22_v2 = vld [vmem:[#allocation1 + $0x1] sm:$0x1]   ;;  %v6_v3 = vld [vmem:[#allocation1] sm:$0x1]  }
   0xa   :  { %11 = vrot.lane.b32.xlu0 %v10_v1, %s36_s0  ;;  %23 = vrot.lane.b32.xlu1 %v22_v2, %s37_s8  ;;  %v16_v4 = vld [vmem:[#allocation1 + $0x2] sm:$0x1]   ;;  %8 = vst.msk [vmem:[#allocation0] sm:$0x1] %vm7_vm0, %v6_v3  }
   0xe   :  { %17 = vrot.lane.b32.xlu0 %v16_v4, %s38_s9 }
  0x7c   :  { %v12_v5 = vpop.permute.xlu0 %11   ;;  %v24_v6 = vpop.permute.xlu1 %23  }
  0x7d   :  { %14 = vst.msk [vmem:[#allocation0] sm:$0x1] %vm13_vm1, %v12_v5  }
  0x80   :  { %v18_v7 = vpop.permute.xlu0 %17  }
  0x81   :  { %20 = vst.msk [vmem:[#allocation0] sm:$0x1] %vm19_vm2, %v18_v7  }
  0x82   :  { %26 = vst.msk [vmem:[#allocation0] sm:$0x1] %vm25_vm3, %v24_v6  }
  0x89   :  { %v30_v8 = vld [vmem:[#allocation0] sm:$0x1] }
  0x8a   :  { %32 = vst [vmem:[%s56_s1] sm:$0x1] %v30_v8 }

// kernel: unet_up_forward_nhwc.1
= control target key start
LH: loop header
LB: loop body
LE: loop exit
PB: predicated region body
PF: predicated region fallthrough
CT: control target
= control target key end

     0   :  { %s2871_s15 = smov 0   ;;  %s2873_s16 = smov 0   ;;  %s3354_s0 = inlined_call_operand.vmem [shape: f32[8,9,9,4], index: 0, kind: input, shape index: {}]   ;;  %s3355_s1 = inlined_call_operand.vmem [shape: f32[2,10,10,4], index: 1, kind: input, shape index: {}]   ;;  %s3356_s2 = inlined_call_operand.vmem [shape: bf16[100,16], index: 2, kind: input, shape index: {}]   ;;  %s3357_s3 = inlined_call_operand.vmem [shape: f32[1,16], index: 3, kind: input, shape index: {}]   ;;  %s3358_s4 = inlined_call_operand.vmem [shape: f32[2,8,2,8,8], index: 4, kind: output, shape index: {}]  }
   0x1   :  { %s2875_s17 = smov 0   ;;  %s2877_s18 = smov 0  }
   0x2   :  { %s2879_s19 = smov 0  }
   0x3 LB: > { %s23_s20 = sadd.s32 1, %s2835_s17  ;;  %s26_s21 = sadd.s32 1, %s2839_s18  ;;  %s2843_s19 = sphi %s2879_s19, %s14_s19   ;;  %s2839_s18 = sphi %s2877_s18, %s3362_s18   ;;  %s2835_s17 = sphi %s2875_s17, %s3361_s17   ;;  %s2831_s16 = sphi %s2873_s16, %s3360_s16   ;;  %s2827_s15 = sphi %s2871_s15, %s3359_s15  }
   0x4   : > { %p24_p0 = scmp.ge.s32.totalorder %s23_s20, 2  ;;  %p2223_p1 = scmp.ge.s32.totalorder %s2843_s19, 1 }
   0x5   : > { %p188_p2 = scmp.lt.s32.totalorder %s2843_s19, 5 }
   0x6   : > { %s3364_s20 = smov (%p24_p0, %s23_s20), 0  ;;  %s3366_s21 = smov (!%p24_p0, %s26_s21), %s2839_s18 }
   0x7   : > { %p189_p3 = pnand %p2223_p1, %p188_p2  ;;  %p28_p4 = scmp.ge.s32.totalorder %s3366_s21, 2 }
   0x8   : > { %vm279_vm0 = vcmask (!%p189_p3), 1041408   ;;  %v1117_v0 = vld [vmem:[%s3356_s2 + $0x18] sm:$0x3] (!%p189_p3)  ;;  %s2224_s24 = sshll.u32 (!%p189_p3), %s2831_s16, 2  ;;  %v258_v6 = vld [vmem:[%s3356_s2] sm:$0x3] (!%p189_p3) }
   0x9   : > { %s3368_s21 = smov (%p28_p4, %s3366_s21), 0  ;;  %192 = sbr.rel (%p189_p3) target bundleno = 510 (0x1fe), region = 36 }
   0xa   : > { %2737 = vmatprep.subr.msk.bf16.mxu0 (!%p189_p3), %vm279_vm0, %v1117_v0  ;;  %v2793_v1 = vld [vmem:[%s3356_s2] ss:$0 sps:$4 sm:$0xcc] (!%p189_p3)   ;;  %v1125_v2 = vsel (!%p189_p3), %vm279_vm0, %v1117_v0, 0  ;;  %p226_p5 = scmp.lt.s32.totalorder (!%p189_p3), %s2224_s24, 7  ;;  %s2397_s6 = sshll.u32 (!%p189_p3), %s2827_s15, 6 }
   0xb   : > { %2552 = vmatpush3.bf16.msra.mxu0 (!%p189_p3), %v1125_v2  ;;  %v2794_v3 = vld [vmem:[%s3356_s2 + $0x18] ss:$0 sps:$4 sm:$0xcc] (!%p189_p3)   ;;  %v271_v4 = vrot.slane (!%p189_p3), %v2793_v1, 2  ;;  %vm272_vm1 = vcmask (!%p189_p3), 31744   ;;  %v339_v19 = vsel (!%p189_p3), %vm279_vm0, %v258_v6, 0 }
   0xc   : > { %v1192_v5 = vrot.slane (!%p189_p3), %v2794_v3, 2  ;;  %v1261_v29 = vld [vmem:[%s3356_s2 + $0x1c] sm:$0x3] (!%p189_p3)  ;;  %v396_v31 = vld [vmem:[%s3356_s2 + $0x4] sm:$0x3] (!%p189_p3)  ;;  %p232_p6 = scmp.lt.s32.totalorder (!%p189_p3), %s2831_s16, 1 }
   0xd   : > { %2725 = vmatprep.subr.msk.bf16.mxu1 (!%p189_p3), %vm279_vm0, %v271_v4  ;;  %v281_v7 = vsel (!%p189_p3), %vm279_vm0, %v271_v4, 0  ;;  %v2795_v41 = vld [vmem:[%s3356_s2 + $0x1c] ss:$0 sps:$4 sm:$0xcc] (!%p189_p3)   ;;  %v404_v49 = vsel (!%p189_p3), %vm279_vm0, %v396_v31, 0  ;;  %v1269_v51 = vsel (!%p189_p3), %vm279_vm0, %v1261_v29, 0 }
   0xe   : > { %2480 = vmatpush3.bf16.msra.mxu1 (!%p189_p3), %v281_v7  ;;  %2738 = vmatprep.subr.msk.bf16.mxu0 (!%p189_p3), %vm279_vm0, %v1192_v5  ;;  %v1200_v23 = vsel (!%p189_p3), %vm279_vm0, %v1192_v5, 0  ;;  %v2796_v44 = vld [vmem:[%s3356_s2 + $0x4] ss:$0 sps:$4 sm:$0xcc] (!%p189_p3)   ;;  %v1334_v53 = vrot.slane (!%p189_p3), %v2795_v41, 2  ;;  %s2227_s29 = sshll.u32 (!%p189_p3), %s2827_s15, 2 }
   0xf   : > { %2726 = vmatprep.subr.msk.bf16.mxu1 (!%p189_p3), %vm279_vm0, %v258_v6  ;;  %v469_v54 = vrot.slane (!%p189_p3), %v2796_v44, 2  ;;  %p240_p7 = scmp.lt.s32.totalorder (!%p189_p3), %s2227_s29, 7  ;;  %vm2054_vm2 = vcmask (!%p189_p3), 64512  }
  0x10   : > { %s3370_s24 = smov (!%p226_p5, %s2224_s24), 7  ;;  %s3372_s16 = smov (!%p232_p6, %s2831_s16), 1 }
  0x11   : > { %s2750_s5 = smul.u32 144, %s3370_s24  ;;  %v477_v7 = vsel %vm279_vm0, %v469_v54, 0  ;;  %s3374_s29 = smov (!%p240_p7, %s2227_s29), 7 }
  0x12   : > { %s2751_s26 = smul.u32 160, %s3372_s16  ;;  %s2228_s30 = sshll.u32 %s3374_s29, 1 }
  0x13   : > { %s230_s9 = scalar_lea.vmem %s3354_s0, %s2750_s5 }
  0x14   : > { %s2930_s10 = scalar_lea.vmem %s230_s9, %s2397_s6  ;;  %s236_s8 = scalar_lea.vmem %s3355_s1, %s2751_s26 }
  0x15   : > { %v2234_v8 = vld [vmem:[%s2930_s10 + $0x90] sm:$0xff]  ;;  %v2934_v9 = vld [vmem:[%s2930_s10 + $0xa0] sm:$0xff]  ;;  %s3111_s9 = scalar_lea.vmem %s236_s8, %s2397_s6 }
  0x16   : > { %v2937_v10 = vld [vmem:[%s2930_s10 + $0x130] sm:$0xff]  ;;  %v265_v11 = vpack.c.bf16 %v2934_v9, %v2234_v8  ;;  %v2941_v12 = vld [vmem:[%s2930_s10 + $0x140] sm:$0xff] }
  0x17   : > { %v2944_v13 = vld [vmem:[%s2930_s10 + $0xb0] sm:$0xff]  ;;  %v2947_v14 = vld [vmem:[%s2930_s10 + $0xc0] sm:$0xff]  ;;  %v1115_v15 = vpack.c.bf16 %v2941_v12, %v2937_v10 }
  0x18   : > { %v266_v16 = vpack.c.bf16 %v2947_v14, %v2944_v13  ;;  %v2954_v17 = vld [vmem:[%s2930_s10 + $0x150] sm:$0xff]  ;;  %v2315_v18 = vld [vmem:[%s2930_s10 + $0x160] sm:$0xff]  ;;  %v898_v21 = vpack.c.bf16 %v2944_v13, %v2934_v9  ;;  %2481 = vmatprep.mubr.msk.bf16.mxu1 %vm272_vm1, %v265_v11 }
  0x19   : > { %v252_v20 = vld [vmem:[%s2930_s10] sm:$0xff]  ;;  %v1116_v22 = vpack.c.bf16 %v2315_v18, %v2954_v17  ;;  %v2965_v24 = vld [vmem:[%s2930_s10 + $0x10] sm:$0xff]  ;;  %2553 = vmatprep.mubr.msk.bf16.mxu0 %vm272_vm1, %v1115_v15  ;;  %v1342_v15 = vsel %vm279_vm0, %v1334_v53, 0 }
  0x1a   : > { %v2968_v25 = vld [vmem:[%s2930_s10 + $0x1c0] sm:$0xff]  ;;  %v2971_v26 = vld [vmem:[%s2930_s10 + $0x1d0] sm:$0xff]  ;;  %2482 = vmatmul.mubr.msk.bf16.vlgmr.msra.gmra.mrb[0].mxu1 %vm272_vm1, %v266_v16  ;;  %v256_v27 = vpack.c.bf16 %v2965_v24, %v252_v20 }
  0x1b   : > { %v1186_v28 = vpack.c.bf16 %v2971_v26, %v2968_v25  ;;  %v2982_v30 = vld [vmem:[%s2930_s10 + $0x20] sm:$0xff]  ;;  %2554 = vmatmul.mubr.msk.bf16.vlgmr.msra.gmra.mrb[0].mxu0 %vm272_vm1, %v1116_v22  ;;  %2486 = vmatpush3.bf16.msra.mxu1 %v339_v19  ;;  %v2992_v33 = vld [vmem:[%s2930_s10 + $0x11] sm:$0xff]  ;;  %v540_v19 = vld [vmem:[%s3356_s2 + $0x8] sm:$0x3] }
  0x1c   : > { %v827_v32 = vpack.c.bf16 %v2982_v30, %v2965_v24  ;;  %2558 = vmatpush3.bf16.msra.mxu0 %v1200_v23  ;;  %2487 = vmatprep.mubr.msk.bf16.mxu1 %vm272_vm1, %v256_v27  ;;  %v2995_v34 = vld [vmem:[%s2930_s10 + $0x21] sm:$0xff]  ;;  %v3003_v36 = vld [vmem:[%s2930_s10 + $0x30] sm:$0xff]  ;;  %v2797_v27 = vld [vmem:[%s3356_s2 + $0x20] ss:$0 sps:$4 sm:$0xcc]  }
  0x1d   : > { %2559 = vmatprep.mubr.msk.bf16.mxu0 %vm272_vm1, %v1186_v28  ;;  %2739 = vmatprep.subr.msk.bf16.mxu0 %vm279_vm0, %v1261_v29  ;;  %v971_v35 = vpack.c.bf16 %v2995_v34, %v2992_v33  ;;  %v3006_v37 = vld [vmem:[%s2930_s10 + $0xa1] sm:$0xff]  ;;  %v3009_v38 = vld [vmem:[%s2930_s10 + $0xb1] sm:$0xff]  ;;  %v257_v45 = vpack.c.bf16 %v3003_v36, %v2982_v30  ;;  %v1834_v24 = vld [vmem:[%s3356_s2 + $0x2c] sm:$0x3] }
  0x1e   : > { %2727 = vmatprep.subr.msk.bf16.mxu1 %vm279_vm0, %v396_v31  ;;  %v3012_v39 = vld [vmem:[%s2930_s10 + $0x1e0] sm:$0xff]  ;;  %v2323_v40 = vld [vmem:[%s2930_s10 + $0x1f0] sm:$0xff]  ;;  %v1040_v42 = vpack.c.bf16 %v3009_v38, %v3006_v37  ;;  %v1842_v13 = vsel %vm279_vm0, %v1834_v24, 0 }
  0x1f   : > { %v390_v43 = vld [vmem:[%s2930_s10 + $0x1] sm:$0xff]  ;;  %v3027_v46 = vld [vmem:[%s2930_s10 + $0x131] sm:$0xff]  ;;  %v1187_v48 = vpack.c.bf16 %v2323_v40, %v3012_v39 }
  0x20   : > { %v3030_v47 = vld [vmem:[%s2930_s10 + $0x141] sm:$0xff]  ;;  %v394_v50 = vpack.c.bf16 %v2992_v33, %v390_v43  ;;  %v3046_v55 = vld [vmem:[%s2930_s10 + $0x31] sm:$0xff]  ;;  %v548_v43 = vsel %vm279_vm0, %v540_v19, 0 }
  0x21   : > { %v1259_v52 = vpack.c.bf16 %v3030_v47, %v3027_v46  ;;  %v3049_v56 = vld [vmem:[%s2930_s10 + $0x151] sm:$0xff]  ;;  %v3052_v57 = vld [vmem:[%s2930_s10 + $0x40] sm:$0xff]  ;;  %v395_v63 = vpack.c.bf16 %v3046_v55, %v2995_v34  ;;  %v2798_v40 = vld [vmem:[%s3356_s2 + $0x8] ss:$0 sps:$4 sm:$0xcc]  }
  0x22   : > { %v2330_v58 = vld [vmem:[%s2930_s10 + $0x161] sm:$0xff]  ;;  %v828_v59 = vpack.c.bf16 %v3052_v57, %v3003_v36  ;;  %v3061_v60 = vld [vmem:[%s2930_s10 + $0xd0] sm:$0xff]  ;;  %v2803_v36 = vld [vmem:[%s3356_s2 + $0x2c] ss:$0 sps:$4 sm:$0xcc]  }
  0x23   : > { %v2245_v61 = vld [vmem:[%s2930_s10 + $0x91] sm:$0xff]  ;;  %v899_v62 = vpack.c.bf16 %v3061_v60, %v2947_v14  ;;  %v3069_v0 = vld [vmem:[%s2930_s10 + $0x1c1] sm:$0xff]  ;;  %v1260_v3 = vpack.c.bf16 %v2330_v58, %v3049_v56 }
  0x24   : > { %v3072_v1 = vld [vmem:[%s2930_s10 + $0x1d1] sm:$0xff]  ;;  %v3075_v2 = vld [vmem:[%s2930_s10 + $0x41] sm:$0xff]  ;;  %v463_v8 = vpack.c.bf16 %v3006_v37, %v2245_v61 }
  0x25   : > { %v3079_v4 = vld [vmem:[%s2930_s10 + $0xc1] sm:$0xff]  ;;  %v972_v5 = vpack.c.bf16 %v3075_v2, %v3046_v55  ;;  %v3084_v6 = vld [vmem:[%s2930_s10 + $0xd1] sm:$0xff]  ;;  %v1328_v16 = vpack.c.bf16 %v3072_v1, %v3069_v0 }
  0x26   : > { %2488 = vmatmul.mubr.msk.bf16.vlgmr.msra.gmra.mrb[0].mxu1 %vm272_vm1, %v257_v45  ;;  %v1041_v11 = vpack.c.bf16 %v3084_v6, %v3079_v4  ;;  %v1404_v18 = vld [vmem:[%s3356_s2 + $0x20] sm:$0x3]  ;;  %v2336_v22 = vld [vmem:[%s2930_s10 + $0x1f1] sm:$0xff]  ;;  %v464_v28 = vpack.c.bf16 %v3079_v4, %v3009_v38 }
  0x27   : > { %2560 = vmatmul.mubr.msk.bf16.vlgmr.msra.gmra.mrb[0].mxu0 %vm272_vm1, %v1187_v48  ;;  %2492 = vmatpush3.bf16.msra.mxu1 %v404_v49  ;;  %v3114_v20 = vld [vmem:[%s2930_s10 + $0x1e1] sm:$0xff]  ;;  %v3125_v31 = vld [vmem:[%s3111_s9 + $0x10] sm:$0xff]  ;;  %v1412_v45 = vsel %vm279_vm0, %v1404_v18, 0  ;;  %v1477_v49 = vrot.slane %v2797_v27, 2  ;;  %v2390_v6 = vld [vmem:[%s3357_s3] ss:$0 sm:$0xff] }
  0x28   : > { %2564 = vmatpush3.bf16.msra.mxu0 %v1269_v51  ;;  %2493 = vmatprep.mubr.msk.bf16.mxu1 %vm272_vm1, %v394_v50  ;;  %v2253_v23 = vld [vmem:[%s2930_s10 + $0x120] sm:$0xff]  ;;  %v1329_v41 = vpack.c.bf16 %v2336_v22, %v3114_v20  ;;  %v615_v50 = vrot.slane %v2798_v40, 2  ;;  %v3143_v51 = vld [vmem:[%s3111_s9 + $0x30] sm:$0xff]  ;;  %v2800_v27 = vld [vmem:[%s3356_s2 + $0xc] ss:$0 sps:$4 sm:$0xcc]  }
  0x29   : > { %2565 = vmatprep.mubr.msk.bf16.mxu0 %vm272_vm1, %v1259_v52  ;;  %2740 = vmatprep.subr.msk.bf16.mxu0 %vm279_vm0, %v1334_v53  ;;  %v1398_v29 = vld [vmem:[%s3111_s9] sm:$0xff]  ;;  %v538_v44 = vpack.c.bf16 %v2937_v10, %v2253_v23  ;;  %v2260_v52 = vld [vmem:[%s2930_s10 + $0x1b0] sm:$0xff]  ;;  %v539_v53 = vpack.c.bf16 %v2954_v17, %v2941_v12  ;;  %v684_v17 = vld [vmem:[%s3356_s2 + $0xc] sm:$0x3] }
  0x2a   : > { %2728 = vmatprep.subr.msk.bf16.mxu1 %vm279_vm0, %v469_v54  ;;  %v1402_v48 = vpack.c.bf16 %v3125_v31, %v1398_v29  ;;  %v1400_v10 = vld [vmem:[%s3111_s9 + $0x20] sm:$0xff]  ;;  %v3150_v58 = vld [vmem:[%s3111_s9 + $0x11] sm:$0xff]  ;;  %v692_v29 = vsel %vm279_vm0, %v684_v17, 0 }
  0x2b   : > { %v1467_v54 = vld [vmem:[%s3111_s9 + $0x1] sm:$0xff]  ;;  %v3153_v61 = vpack.c.bf16 %v3143_v51, %v1400_v10  ;;  %v3184_v23 = vld [vmem:[%s3111_s9 + $0x12] sm:$0xff]  ;;  %v1976_v33 = vld [vmem:[%s3356_s2 + $0x30] sm:$0x3] }
  0x2c   : > { %v1546_v12 = vld [vmem:[%s3356_s2 + $0x24] sm:$0x3]  ;;  %v973_v30 = vld [vmem:[%s3356_s2 + $0x14] sm:$0x3]  ;;  %v1984_v55 = vsel %vm279_vm0, %v1976_v33, 0 }
  0x2d   : > { %v1540_v22 = vld [vmem:[%s3111_s9 + $0x2] sm:$0xff]  ;;  %v2804_v57 = vld [vmem:[%s3356_s2 + $0x14] ss:$0 sps:$4 sm:$0xcc]   ;;  %v981_v9 = vsel %vm279_vm0, %v973_v30, 0 }
  0x2e   : > { %v2374_v14 = vld [vmem:[%s3111_s9 + $0x50] sm:$0xff] }
  0x2f   : > { %v2380_v34 = vld [vmem:[%s3111_s9 + $0x51] sm:$0xff] }
  0x30   : > { %v2387_v37 = vld [vmem:[%s3111_s9 + $0x52] sm:$0xff] }
  0x32   : > { %2494 = vmatmul.mubr.msk.bf16.vlgmr.msra.gmra.mrb[0].mxu1 %vm272_vm1, %v395_v63  ;;  %v623_v63 = vsel %vm279_vm0, %v615_v50, 0 }
  0x33   : > { %2566 = vmatmul.mubr.msk.bf16.vlgmr.msra.gmra.mrb[0].mxu0 %vm272_vm1, %v1260_v3  ;;  %2498 = vmatpush3.bf16.msra.mxu1 %v477_v7  ;;  %v609_v3 = vpack.c.bf16 %v2968_v25, %v2260_v52  ;;  %v1485_v7 = vsel %vm279_vm0, %v1477_v49, 0  ;;  %v1469_v25 = vld [vmem:[%s3111_s9 + $0x21] sm:$0xff] }
  0x34   : > { %2570 = vmatpush3.bf16.msra.mxu0 %v1342_v15  ;;  %2499 = vmatprep.mubr.msk.bf16.mxu1 %vm272_vm1, %v463_v8  ;;  %v1471_v8 = vpack.c.bf16 %v3150_v58, %v1467_v54  ;;  %v3174_v15 = vld [vmem:[%s3111_s9 + $0x31] sm:$0xff]  ;;  %v1614_v54 = vpack.c.bf16 %v1400_v10, %v3125_v31  ;;  %v752_v31 = vpack.c.bf16 %v3114_v20, %v3072_v1  ;;  %v2802_v10 = vld [vmem:[%s3356_s2 + $0x10] ss:$0 sps:$4 sm:$0xcc]   ;;  %v2359_v1 = vld [vmem:[%s3111_s9 + $0x41] sm:$0xff] }
  0x35   : > { %2571 = vmatprep.mubr.msk.bf16.mxu0 %vm272_vm1, %v1328_v16  ;;  %2741 = vmatprep.subr.msk.bf16.mxu0 %vm279_vm0, %v1404_v18  ;;  %v2267_v16 = vld [vmem:[%s2930_s10 + $0x121] sm:$0xff]  ;;  %v1688_v20 = vpack.c.bf16 %v2359_v1, %v3174_v15 }
  0x36   : > { %2729 = vmatprep.subr.msk.bf16.mxu1 %vm279_vm0, %v540_v19  ;;  %v2799_v18 = vld [vmem:[%s3356_s2 + $0x24] ss:$0 sps:$4 sm:$0xcc]   ;;  %v610_v19 = vpack.c.bf16 %v3012_v39, %v2971_v26  ;;  %v682_v40 = vpack.c.bf16 %v3027_v46, %v2267_v16  ;;  %v1544_v26 = vpack.c.bf16 %v3184_v23, %v1540_v22  ;;  %v904_v16 = vrot.slane %v2802_v10, 2 }
  0x37   : > { %v1620_v39 = vrot.slane %v2799_v18, 2  ;;  %v1542_v46 = vld [vmem:[%s3111_s9 + $0x22] sm:$0xff] }
  0x3e   : > { %2500 = vmatmul.mubr.msk.bf16.vlgmr.msra.gmra.mrb[0].mxu1 %vm272_vm1, %v464_v28  ;;  %v3190_v28 = vpack.c.bf16 %v3174_v15, %v1469_v25  ;;  %v1046_v15 = vrot.slane %v2804_v57, 2 }
  0x3f   : > { %2572 = vmatmul.mubr.msk.bf16.vlgmr.msra.gmra.mrb[0].mxu0 %vm272_vm1, %v1329_v41  ;;  %2504 = vmatpush3.bf16.msra.mxu1 %v548_v43  ;;  %v1554_v41 = vsel %vm279_vm0, %v1546_v12, 0  ;;  %v757_v43 = vrot.slane %v2800_v27, 2 }
  0x40   : > { %2576 = vmatpush3.bf16.msra.mxu0 %v1412_v45  ;;  %2505 = vmatprep.mubr.msk.bf16.mxu1 %vm272_vm1, %v538_v44  ;;  %v1543_v44 = vld [vmem:[%s3111_s9 + $0x32] sm:$0xff] }
  0x41   : > { %2577 = vmatprep.mubr.msk.bf16.mxu0 %vm272_vm1, %v1402_v48  ;;  %2742 = vmatprep.subr.msk.bf16.mxu0 %vm279_vm0, %v1477_v49  ;;  %v2273_v45 = vld [vmem:[%s2930_s10 + $0x1b1] sm:$0xff]  ;;  %v683_v48 = vpack.c.bf16 %v3049_v56, %v3030_v47  ;;  %v3208_v49 = vpack.c.bf16 %v1543_v44, %v1542_v46  ;;  %v2352_v56 = vld [vmem:[%s3111_s9 + $0x40] sm:$0xff]  ;;  %s2229_s10 = sshll.u32 %s3372_s16, 4  ;;  %s2845_s16 = smov 120  }
  0x42   : > { %2730 = vmatprep.subr.msk.bf16.mxu1 %vm279_vm0, %v615_v50  ;;  %v765_v50 = vsel %vm279_vm0, %v757_v43, 0  ;;  %v751_v52 = vpack.c.bf16 %v3069_v0, %v2273_v45  ;;  %v829_v47 = vld [vmem:[%s3356_s2 + $0x10] sm:$0x3]  ;;  %v2801_v0 = vld [vmem:[%s3356_s2 + $0x28] ss:$0 sps:$4 sm:$0xcc]   ;;  %v1833_v60 = vpack.c.bf16 %v2374_v14, %v2352_v56  ;;  %s244_s5 = sadd.s32 %s2229_s10, %s2228_s30 }
  0x4a   : > { %2506 = vmatmul.mubr.msk.bf16.vlgmr.msra.gmra.mrb[0].mxu1 %vm272_vm1, %v539_v53  ;;  %v1628_v53 = vsel %vm279_vm0, %v1620_v39, 0 }
  0x4b   : > { %2578 = vmatmul.mubr.msk.bf16.vlgmr.msra.gmra.mrb[0].mxu0 %vm272_vm1, %v3153_v61  ;;  %2510 = vmatpush3.bf16.msra.mxu1 %v623_v63  ;;  %v1689_v63 = vld [vmem:[%s3356_s2 + $0x28] sm:$0x3] }
  0x4c   : > { %2582 = vmatpush3.bf16.msra.mxu0 %v1485_v7  ;;  %2511 = vmatprep.mubr.msk.bf16.mxu1 %vm272_vm1, %v609_v3  ;;  %v1615_v3 = vpack.c.bf16 %v2352_v56, %v3143_v51  ;;  %v837_v7 = vsel %vm279_vm0, %v829_v47, 0  ;;  %v912_v51 = vsel %vm279_vm0, %v904_v16, 0 }
  0x4d   : > { %2583 = vmatprep.mubr.msk.bf16.mxu0 %vm272_vm1, %v1471_v8  ;;  %2743 = vmatprep.subr.msk.bf16.mxu0 %vm279_vm0, %v1546_v12  ;;  %v1697_v8 = vsel %vm279_vm0, %v1689_v63, 0  ;;  %v1687_v12 = vpack.c.bf16 %v1469_v25, %v3150_v58  ;;  %v1756_v25 = vpack.c.bf16 %v1542_v46, %v3184_v23 }
  0x4e   : > { %2731 = vmatprep.subr.msk.bf16.mxu1 %vm279_vm0, %v684_v17  ;;  %v1762_v17 = vrot.slane %v2801_v0, 2 }
  0x50   : > { %v1770_v58 = vsel %vm279_vm0, %v1762_v17, 0 }
  0x56   : > { %2512 = vmatmul.mubr.msk.bf16.vlgmr.msra.gmra.mrb[0].mxu1 %vm272_vm1, %v610_v19 }
  0x57   : > { %2584 = vmatmul.mubr.msk.bf16.vlgmr.msra.gmra.mrb[0].mxu0 %vm272_vm1, %v3190_v28  ;;  %2516 = vmatpush3.bf16.msra.mxu1 %v692_v29 }
  0x58   : > { %2588 = vmatpush3.bf16.msra.mxu0 %v1554_v41  ;;  %2517 = vmatprep.mubr.msk.bf16.mxu1 %vm272_vm1, %v682_v40 }
  0x59   : > { %2589 = vmatprep.mubr.msk.bf16.mxu0 %vm272_vm1, %v1544_v26  ;;  %2744 = vmatprep.subr.msk.bf16.mxu0 %vm279_vm0, %v1620_v39 }
  0x5a   : > { %2732 = vmatprep.subr.msk.bf16.mxu1 %vm279_vm0, %v757_v43 }
  0x62   : > { %2518 = vmatmul.mubr.msk.bf16.vlgmr.msra.gmra.mrb[0].mxu1 %vm272_vm1, %v683_v48 }
  0x63   : > { %2590 = vmatmul.mubr.msk.bf16.vlgmr.msra.gmra.mrb[0].mxu0 %vm272_vm1, %v3208_v49  ;;  %2522 = vmatpush3.bf16.msra.mxu1 %v765_v50 }
  0x64   : > { %2594 = vmatpush3.bf16.msra.mxu0 %v1628_v53  ;;  %2523 = vmatprep.mubr.msk.bf16.mxu1 %vm272_vm1, %v751_v52 }
  0x65   : > { %2595 = vmatprep.mubr.msk.bf16.mxu0 %vm272_vm1, %v1614_v54  ;;  %2745 = vmatprep.subr.msk.bf16.mxu0 %vm279_vm0, %v1689_v63 }
  0x66   : > { %2733 = vmatprep.subr.msk.bf16.mxu1 %vm279_vm0, %v829_v47 }
  0x6e   : > { %2524 = vmatmul.mubr.msk.bf16.vlgmr.msra.gmra.mrb[0].mxu1 %vm272_vm1, %v752_v31 }
  0x6f   : > { %2596 = vmatmul.mubr.msk.bf16.vlgmr.msra.gmra.mrb[0].mxu0 %vm272_vm1, %v1615_v3  ;;  %2528 = vmatpush3.bf16.msra.mxu1 %v837_v7 }
  0x70   : > { %2600 = vmatpush3.bf16.msra.mxu0 %v1697_v8  ;;  %2529 = vmatprep.mubr.msk.bf16.mxu1 %vm272_vm1, %v827_v32  ;;  %v2365_v32 = vld [vmem:[%s3111_s9 + $0x42] sm:$0xff]  ;;  %s2230_s9 = sshll.u32 %s244_s5, 3 }
  0x71   : > { %2601 = vmatprep.mubr.msk.bf16.mxu0 %vm272_vm1, %v1687_v12  ;;  %2746 = vmatprep.subr.msk.bf16.mxu0 %vm279_vm0, %v1762_v17  ;;  %v1975_v38 = vpack.c.bf16 %v2387_v37, %v2365_v32  ;;  %s246_s12 = scalar_lea.vmem %s3358_s4, %s2230_s9 }
  0x72   : > { %2734 = vmatprep.subr.msk.bf16.mxu1 %vm279_vm0, %v904_v16 }
  0x7a   : > { %2530 = vmatmul.mubr.msk.bf16.vlgmr.msra.gmra.mrb[0].mxu1 %vm272_vm1, %v828_v59  ;;  %v1757_v59 = vpack.c.bf16 %v2365_v32, %v1543_v44 }
  0x7b   : > { %2602 = vmatmul.mubr.msk.bf16.vlgmr.msra.gmra.mrb[0].mxu0 %vm272_vm1, %v1688_v20  ;;  %2534 = vmatpush3.bf16.msra.mxu1 %v912_v51 }
  0x7c   : > { %2606 = vmatpush3.bf16.msra.mxu0 %v1770_v58  ;;  %2535 = vmatprep.mubr.msk.bf16.mxu1 %vm272_vm1, %v898_v21  ;;  %v1907_v21 = vrot.slane %v2803_v36, 2 }
  0x7d   : > { %2607 = vmatprep.mubr.msk.bf16.mxu0 %vm272_vm1, %v1756_v25  ;;  %2747 = vmatprep.subr.msk.bf16.mxu0 %vm279_vm0, %v1834_v24 }
  0x7e   : > { %2735 = vmatprep.subr.msk.bf16.mxu1 %vm279_vm0, %v973_v30  ;;  %v1915_v18 = vsel %vm279_vm0, %v1907_v21, 0 }
  0x86   : > { %2536 = vmatmul.mubr.msk.bf16.vlgmr.msra.gmra.mrb[0].mxu1 %vm272_vm1, %v899_v62  ;;  %v1054_v62 = vsel %vm279_vm0, %v1046_v15, 0 }
  0x87   : > { %2608 = vmatmul.mubr.msk.bf16.vlgmr.msra.gmra.mrb[0].mxu0 %vm272_vm1, %v1757_v59  ;;  %2540 = vmatpush3.bf16.msra.mxu1 %v981_v9 }
  0x88   : > { %2612 = vmatpush3.bf16.msra.mxu0 %v1842_v13  ;;  %2541 = vmatprep.mubr.msk.bf16.mxu1 %vm272_vm1, %v971_v35  ;;  %v1902_v35 = vpack.c.bf16 %v2380_v34, %v2359_v1 }
  0x89   : > { %2613 = vmatprep.mubr.msk.bf16.mxu0 %vm272_vm1, %v3153_v61  ;;  %2748 = vmatprep.subr.msk.bf16.mxu0 %vm279_vm0, %v1907_v21 }
  0x8a   : > { %2736 = vmatprep.subr.msk.bf16.mxu1 %vm279_vm0, %v1046_v15 }
  0x92   : > { %2542 = vmatmul.mubr.msk.bf16.vlgmr.msra.gmra.mrb[0].mxu1 %vm272_vm1, %v972_v5 }
  0x93   : > { %2614 = vmatmul.mubr.msk.bf16.vlgmr.msra.gmra.mrb[0].mxu0 %vm272_vm1, %v1833_v60  ;;  %2546 = vmatpush3.bf16.msra.mxu1 %v1054_v62 }
  0x94   : > { %2618 = vmatpush3.bf16.msra.mxu0 %v1915_v18  ;;  %2547 = vmatprep.mubr.msk.bf16.mxu1 %vm272_vm1, %v1040_v42 }
  0x95   : > { %2619 = vmatprep.mubr.msk.bf16.mxu0 %vm272_vm1, %v3190_v28  ;;  %2749 = vmatprep.subr.msk.bf16.mxu0 %vm279_vm0, %v1976_v33 }
  0x9e   : > { %2548 = vmatmul.mubr.msk.bf16.vlgmr.msra.gmra.mrb[0].mxu1 %vm272_vm1, %v1041_v11 }
  0x9f   : > { %2620 = vmatmul.mubr.msk.bf16.vlgmr.msra.gmra.mrb[0].mxu0 %vm272_vm1, %v1902_v35 }
  0xa0   : > { %2624 = vmatpush3.bf16.msra.mxu0 %v1984_v55  ;;  %2625 = vmatprep.mubr.msk.bf16.mxu0 %vm272_vm1, %v3208_v49 }
  0xab   : > { %2626 = vmatmul.mubr.msk.bf16.vlgmr.msra.gmra.mrb[0].mxu0 %vm272_vm1, %v1975_v38 }
 0x171   : > { %v2549_v42 = vpop.f32.mrb[0].mxu1 }
 0x172   : > { %v1090_v2 = vpop.f32.mrb[1].mxu1 }
 0x173   : > { %v2550_v5 = vpop.f32.mrb[2].mxu1 }
 0x174   : > { %v1093_v61 = vpop.f32.mrb[3].mxu1 }
 0x17e   : > { %v2627_v4 = vpop.f32.mrb[0].mxu0 }
 0x17f   : > { %v2629_v11 = vadd.f32 %v2627_v4, %v2549_v42  ;;  %v2020_v19 = vpop.f32.mrb[1].mxu0 }
 0x180   : > { %v2630_v22 = vadd.f32 %v2020_v19, %v1090_v2  ;;  %v2628_v23 = vpop.f32.mrb[2].mxu0 }
 0x181   : > { %v2631_v27 = vadd.f32 %v2628_v23, %v2550_v5  ;;  %v2023_v28 = vpop.f32.mrb[3].mxu0  ;;  %v2048_v29 = vadd.f32 %v2629_v11, %v2390_v6 }
 0x182   : > { %v2632_v40 = vadd.f32 %v2023_v28, %v1093_v61  ;;  %v2046_v41 = vadd.f32 %v2630_v22, %v2390_v6 }
 0x183   : > { %v2049_v26 = vadd.f32 %v2631_v27, %v2390_v6  ;;  %v2052_v39 = vmax.f32 %v2048_v29, 0.0 }
 0x184   : > { %v2047_v43 = vadd.f32 %v2632_v40, %v2390_v6  ;;  %v2050_v46 = vmax.f32 %v2046_v41, 0.0 }
 0x185   : > { %v2053_v44 = vmax.f32 %v2049_v26, 0.0  ;;  %2067 = vrot.lane.b32.xlu1 %v2052_v39, %s2845_s16  ;;  %2057 = vst.msk [vmem:[%s246_s12 + $0x20] sm:$0xff] %vm2054_vm2, %v2052_v39 }
 0x186   : > { %v2051_v45 = vmax.f32 %v2047_v43, 0.0  ;;  %2063 = vrot.lane.b32.xlu0 %v2050_v46, %s2845_s16  ;;  %2055 = vst.msk [vmem:[%s246_s12] sm:$0xff] %vm2054_vm2, %v2050_v46 }
 0x187   : > { %2058 = vst.msk [vmem:[%s246_s12 + $0x30] sm:$0xff] %vm2054_vm2, %v2053_v44 }
 0x188   : > { %2056 = vst.msk [vmem:[%s246_s12 + $0x10] sm:$0xff] %vm2054_vm2, %v2051_v45 }
 0x189   : > { %2069 = vrot.lane.b32.xlu1 %v2053_v44, %s2845_s16 }
 0x18a   : > { %2065 = vrot.lane.b32.xlu0 %v2051_v45, %s2845_s16 }
 0x1f7   : > { %v2068_v48 = vpop.permute.xlu1 %2067 }
 0x1f8   : > { %2393 = vst.msk [vmem:[%s246_s12 + $0x28] sm:$0xff] %vm2054_vm2, %v2068_v48  ;;  %v2064_v49 = vpop.permute.xlu0 %2063 }
 0x1f9   : > { %2391 = vst.msk [vmem:[%s246_s12 + $0x8] sm:$0xff] %vm2054_vm2, %v2064_v49 }
 0x1fb   : > { %v2070_v50 = vpop.permute.xlu1 %2069 }
 0x1fc   : > { %2394 = vst.msk [vmem:[%s246_s12 + $0x38] sm:$0xff] %vm2054_vm2, %v2070_v50  ;;  %v2066_v52 = vpop.permute.xlu0 %2065 }
 0x1fd   : > { %2392 = vst.msk [vmem:[%s246_s12 + $0x18] sm:$0xff] %vm2054_vm2, %v2066_v52 }
 0x1fe PF: > { %s14_s19 = sadd.s32 1, %s2843_s19   ;;  %s3359_s15 = smov %s2835_s17 }
 0x1ff   : > { %p11_p8 = scmp.ge.s32.totalorder %s14_s19, 6   ;;  %s3360_s16 = smov %s2839_s18 }
 0x200   : > { %s3361_s17 = smov %s3364_s20  ;;  %s3362_s18 = smov %s3368_s21 }
 0x201   :  { %13 = sbr.rel (!%p11_p8) target bundleno = 3 (0x3), region = 81 }

</bundles_post_ra>
